<compile_context>
chip_gen: v6e
topology: v6e:2x2x1
jax: 0.10.0
libtpu: 0.0.40
codegen_flags: <defaults>
</compile_context>

<pallas_src>
import functools

import jax
import jax.numpy as jnp
import numpy as np
from jax.experimental import pallas as pl
from jax.experimental.pallas import tpu as pltpu  # noqa: F401  (TPU backend)

CONTENT_INP_DIM = 896   # config.content_inp_dim
CONTENT_DIM = 256       # config.content_dim
LATENCY_DIM = 64        # config.latency_dim
INTERMEDIATE = 512      # ConcatenateMLP.intermediate_size
HIDDEN = 64             # ConcatenateMLP.hidden_size
N_KNOBS = 21            # config.n_knobs


# ---------------------------------------------------------------------------
# Single fused kernel: content mean+encode, latency fc, concat-free MLP, head.
# ---------------------------------------------------------------------------
def _fused_forward_kernel(x_ref, lat_ref, w_content_ref, w_fc_ref, b_fc_ref,
                          w_up_c_ref, w_up_l_ref, w_down_ref, w_out_ref,
                          b_out_ref, o_ref, *, seq_len):
    # ---- content_encoder + mean(dim=1) ------------------------------------
    # mean(x) @ W == mean(x @ W): reduce over seq first (VPU/XLU), then one
    # small MXU matmul with bf16 operands / f32 accumulation.
    x = x_ref[...].astype(jnp.float32)                    # [bs, seq, 896]
    x_mean = x.sum(axis=1) * (1.0 / seq_len)              # [bs, 896]  (f32)
    c = jnp.dot(x_mean.astype(jnp.bfloat16), w_content_ref[...],
                preferred_element_type=jnp.float32)        # [bs, 256]

    # ---- latency_encoder: B is None -> identity mapping, fc(1 -> 64) ------
    # K=1 matmul is just a broadcast outer product; keep it on the VPU in f32.
    lat = lat_ref[...].astype(jnp.float32)                 # [bs, 1]
    le = lat * w_fc_ref[...] + b_fc_ref[...]               # [bs, 64]

    # ---- ConcatenateMLP (concat removed by splitting W_up) ----------------
    u = (jnp.dot(c.astype(jnp.bfloat16), w_up_c_ref[...],
                 preferred_element_type=jnp.float32)
         + jnp.dot(le.astype(jnp.bfloat16), w_up_l_ref[...],
                   preferred_element_type=jnp.float32))     # [bs, 512]
    u = jnp.maximum(u, 0.0)                                 # act_fn  (ReLU)
    d = jnp.dot(u.astype(jnp.bfloat16), w_down_ref[...],
                preferred_element_type=jnp.float32)          # [bs, 64]
    e = jnp.maximum(d, 0.0)                                  # act_fn2 (ReLU)
    # drop_out(p=0.8): inference-mode identity.
    # TODO(synk): training-mode dropout (stateful PRNG masking) not implemented.

    # ---- out: Linear(64 -> 21, with bias) ----------------------------------
    logits = jnp.dot(e, w_out_ref[...],
                     preferred_element_type=jnp.float32)     # [bs, 21]
    o_ref[...] = (logits + b_out_ref[...]).astype(o_ref.dtype)


def ada_scheduler_forward_pallas(params, x, latency):
    bs, seq_len, _ = x.shape
    lat = latency.reshape(-1, 1)                             # [bs, 1]
    kernel = functools.partial(_fused_forward_kernel, seq_len=seq_len)
    # Gridless call: every operand is a full-array VMEM block (total ~1 MiB,
    # far under the 64 MiB v7x / 128 MiB v5e/v6e VMEM).  If bs/seq grow, add a
    # leading "parallel" batch grid axis and tile x over seq instead.
    return pl.pallas_call(
        kernel,
        out_shape=jax.ShapeDtypeStruct((bs, N_KNOBS), jnp.float32),
    )(x, lat,
      params["w_content"], params["w_fc"], params["b_fc"],
      params["w_up_c"], params["w_up_l"], params["w_down"],
      params["w_out"], params["b_out"])


ada_scheduler_forward = jax.jit(ada_scheduler_forward_pallas)


# ---------------------------------------------------------------------------
# Parameters (deterministic synthetic init; shapes from the module __init__).
# Big MXU weights in bf16, small/VPU-side tensors in f32.
# ---------------------------------------------------------------------------
def init_params(key):
    ks = jax.random.split(key, 8)

    def lin(k, fan_in, fan_out, dtype=jnp.float32):
        w = (jax.random.normal(k, (fan_in, fan_out), jnp.float32)
             / np.sqrt(float(fan_in)))
        return w.astype(dtype)

    # up_proj: Linear(320 -> 512, no bias), pre-split to remove the concat.
    w_up = lin(ks[3], CONTENT_DIM + LATENCY_DIM, INTERMEDIATE, jnp.bfloat16)
    return dict(
        # content_encoder: Linear(896, 256, bias=False)
        w_content=lin(ks[0], CONTENT_INP_DIM, CONTENT_DIM, jnp.bfloat16),
        # latency_encoder.fc: Linear(1, 64)
        w_fc=lin(ks[1], 1, LATENCY_DIM),
        b_fc=0.01 * jax.random.normal(ks[2], (1, LATENCY_DIM), jnp.float32),
        # ConcatenateMLP
        w_up_c=w_up[:CONTENT_DIM, :],        # rows that multiply content feat
        w_up_l=w_up[CONTENT_DIM:, :],        # rows that multiply latency emb
        w_down=lin(ks[4], INTERMEDIATE, HIDDEN, jnp.bfloat16),
        # out: Linear(64, 21)
        w_out=lin(ks[5], HIDDEN, N_KNOBS),
        b_out=0.01 * jax.random.normal(ks[6], (1, N_KNOBS), jnp.float32),
    )


# ---------------------------------------------------------------------------
# Pure-JAX reference with the identical numerics (bf16 MXU operands, f32 acc).
# ---------------------------------------------------------------------------
def reference_forward(params, x, latency):
    x_mean = x.astype(jnp.float32).mean(axis=1)
    c = jnp.dot(x_mean.astype(jnp.bfloat16), params["w_content"],
                preferred_element_type=jnp.float32)
    lat = latency.reshape(-1, 1).astype(jnp.float32)
    le = lat * params["w_fc"] + params["b_fc"]
    u = (jnp.dot(c.astype(jnp.bfloat16), params["w_up_c"],
                 preferred_element_type=jnp.float32)
         + jnp.dot(le.astype(jnp.bfloat16), params["w_up_l"],
                   preferred_element_type=jnp.float32))
    u = jnp.maximum(u, 0.0)
    d = jnp.dot(u.astype(jnp.bfloat16), params["w_down"],
                preferred_element_type=jnp.float32)
    e = jnp.maximum(d, 0.0)
    return jnp.dot(e, params["w_out"],
                   preferred_element_type=jnp.float32) + params["b_out"]


if __name__ == "__main__":
    key = jax.random.PRNGKey(0)
    k_param, k_x, k_lat = jax.random.split(key, 3)

    bs, seq_len = 2, 16
    params = init_params(k_param)
    # Input kept in its native narrow dtype (module spec says fp16 features);
    # the cast happens inside the kernel, not in the wrapper.
    x = jax.random.normal(
        k_x, (bs, seq_len, CONTENT_INP_DIM), jnp.float32).astype(jnp.bfloat16)
    latency = jax.random.uniform(k_lat, (bs,), jnp.float32)

    logits = ada_scheduler_forward(params, x, latency)
    logits = jax.block_until_ready(logits)

    ref = reference_forward(params, x, latency)
    assert logits.shape == (bs, N_KNOBS), logits.shape
    np.testing.assert_allclose(np.asarray(logits), np.asarray(ref),
                               rtol=2e-3, atol=2e-3)
    print("KERNEL_OK")
</pallas_src>

<mosaic_0001>
module attributes {stable_mosaic.version = 11 : i64} {
  func.func @_fused_forward_kernel(%arg0: memref<2x16x896xbf16, #tpu.memory_space<vmem>>, %arg1: memref<2x1xf32, #tpu.memory_space<vmem>>, %arg2: memref<896x256xbf16, #tpu.memory_space<vmem>>, %arg3: memref<1x64xf32, #tpu.memory_space<vmem>>, %arg4: memref<1x64xf32, #tpu.memory_space<vmem>>, %arg5: memref<256x512xbf16, #tpu.memory_space<vmem>>, %arg6: memref<64x512xbf16, #tpu.memory_space<vmem>>, %arg7: memref<512x64xbf16, #tpu.memory_space<vmem>>, %arg8: memref<64x21xf32, #tpu.memory_space<vmem>>, %arg9: memref<1x21xf32, #tpu.memory_space<vmem>>, %arg10: memref<2x21xf32, #tpu.memory_space<vmem>>) attributes {dimension_semantics = [], scalar_prefetch = 0 : i64, scratch_operands = 0 : i64, tpu.core_type = #tpu.core_type<tc>} {
    %c0 = arith.constant 0 : index
    %c0_0 = arith.constant 0 : index
    %c0_1 = arith.constant 0 : index
    %0 = vector.load %arg0[%c0, %c0_0, %c0_1] : memref<2x16x896xbf16, #tpu.memory_space<vmem>>, vector<2x16x896xbf16>
    %1 = arith.extf %0 : vector<2x16x896xbf16> to vector<2x16x896xf32>
    %cst = arith.constant dense<0.000000e+00> : vector<2x896xf32>
    %2 = vector.multi_reduction <add>, %1, %cst [1] : vector<2x16x896xf32> to vector<2x896xf32>
    %cst_2 = arith.constant 6.250000e-02 : f32
    %3 = vector.broadcast %cst_2 : f32 to vector<2x896xf32>
    %4 = arith.mulf %2, %3 : vector<2x896xf32>
    %5 = arith.truncf %4 : vector<2x896xf32> to vector<2x896xbf16>
    %c0_3 = arith.constant 0 : index
    %c0_4 = arith.constant 0 : index
    %6 = vector.load %arg2[%c0_3, %c0_4] : memref<896x256xbf16, #tpu.memory_space<vmem>>, vector<896x256xbf16>
    %cst_5 = arith.constant dense<0.000000e+00> : vector<2x256xf32>
    %7 = tpu.matmul %5, %6, %cst_5 {dimension_numbers = #tpu.dot_dimension_numbers<[1], [0], [0], [1], [0, 0, 1, 1], [], []>} : vector<2x896xbf16>, vector<896x256xbf16>, vector<2x256xf32> -> vector<2x256xf32>
    %c0_6 = arith.constant 0 : index
    %c0_7 = arith.constant 0 : index
    %8 = vector.load %arg1[%c0_6, %c0_7] : memref<2x1xf32, #tpu.memory_space<vmem>>, vector<2x1xf32>
    %c0_8 = arith.constant 0 : index
    %c0_9 = arith.constant 0 : index
    %9 = vector.load %arg3[%c0_8, %c0_9] : memref<1x64xf32, #tpu.memory_space<vmem>>, vector<1x64xf32>
    %10 = vector.broadcast %8 : vector<2x1xf32> to vector<2x64xf32>
    %11 = vector.broadcast %9 : vector<1x64xf32> to vector<2x64xf32>
    %12 = arith.mulf %10, %11 : vector<2x64xf32>
    %c0_10 = arith.constant 0 : index
    %c0_11 = arith.constant 0 : index
    %13 = vector.load %arg4[%c0_10, %c0_11] : memref<1x64xf32, #tpu.memory_space<vmem>>, vector<1x64xf32>
    %14 = vector.broadcast %13 : vector<1x64xf32> to vector<2x64xf32>
    %15 = arith.addf %12, %14 : vector<2x64xf32>
    %16 = arith.truncf %7 : vector<2x256xf32> to vector<2x256xbf16>
    %c0_12 = arith.constant 0 : index
    %c0_13 = arith.constant 0 : index
    %17 = vector.load %arg5[%c0_12, %c0_13] : memref<256x512xbf16, #tpu.memory_space<vmem>>, vector<256x512xbf16>
    %cst_14 = arith.constant dense<0.000000e+00> : vector<2x512xf32>
    %18 = tpu.matmul %16, %17, %cst_14 {dimension_numbers = #tpu.dot_dimension_numbers<[1], [0], [0], [1], [0, 0, 1, 1], [], []>} : vector<2x256xbf16>, vector<256x512xbf16>, vector<2x512xf32> -> vector<2x512xf32>
    %19 = arith.truncf %15 : vector<2x64xf32> to vector<2x64xbf16>
    %c0_15 = arith.constant 0 : index
    %c0_16 = arith.constant 0 : index
    %20 = vector.load %arg6[%c0_15, %c0_16] : memref<64x512xbf16, #tpu.memory_space<vmem>>, vector<64x512xbf16>
    %cst_17 = arith.constant dense<0.000000e+00> : vector<2x512xf32>
    %21 = tpu.matmul %19, %20, %cst_17 {dimension_numbers = #tpu.dot_dimension_numbers<[1], [0], [0], [1], [0, 0, 1, 1], [], []>} : vector<2x64xbf16>, vector<64x512xbf16>, vector<2x512xf32> -> vector<2x512xf32>
    %22 = arith.addf %18, %21 : vector<2x512xf32>
    %cst_18 = arith.constant 0.000000e+00 : f32
    %23 = vector.broadcast %cst_18 : f32 to vector<2x512xf32>
    %24 = arith.maximumf %22, %23 : vector<2x512xf32>
    %25 = arith.truncf %24 : vector<2x512xf32> to vector<2x512xbf16>
    %c0_19 = arith.constant 0 : index
    %c0_20 = arith.constant 0 : index
    %26 = vector.load %arg7[%c0_19, %c0_20] : memref<512x64xbf16, #tpu.memory_space<vmem>>, vector<512x64xbf16>
    %cst_21 = arith.constant dense<0.000000e+00> : vector<2x64xf32>
    %27 = tpu.matmul %25, %26, %cst_21 {dimension_numbers = #tpu.dot_dimension_numbers<[1], [0], [0], [1], [0, 0, 1, 1], [], []>} : vector<2x512xbf16>, vector<512x64xbf16>, vector<2x64xf32> -> vector<2x64xf32>
    %cst_22 = arith.constant 0.000000e+00 : f32
    %28 = vector.broadcast %cst_22 : f32 to vector<2x64xf32>
    %29 = arith.maximumf %27, %28 : vector<2x64xf32>
    %c0_23 = arith.constant 0 : index
    %c0_24 = arith.constant 0 : index
    %30 = vector.load %arg8[%c0_23, %c0_24] : memref<64x21xf32, #tpu.memory_space<vmem>>, vector<64x21xf32>
    %cst_25 = arith.constant dense<0.000000e+00> : vector<2x21xf32>
    %31 = tpu.matmul %29, %30, %cst_25 {dimension_numbers = #tpu.dot_dimension_numbers<[1], [0], [0], [1], [0, 0, 1, 1], [], []>} : vector<2x64xf32>, vector<64x21xf32>, vector<2x21xf32> -> vector<2x21xf32>
    %c0_26 = arith.constant 0 : index
    %c0_27 = arith.constant 0 : index
    %32 = vector.load %arg9[%c0_26, %c0_27] : memref<1x21xf32, #tpu.memory_space<vmem>>, vector<1x21xf32>
    %33 = vector.broadcast %32 : vector<1x21xf32> to vector<2x21xf32>
    %34 = arith.addf %31, %33 : vector<2x21xf32>
    %c0_28 = arith.constant 0 : index
    %c0_29 = arith.constant 0 : index
    %35 = vector.load %arg10[%c0_28, %c0_29] : memref<2x21xf32, #tpu.memory_space<vmem>>, vector<2x21xf32>
    tpu.vector_store %arg10[%c0_28, %c0_29], %34 {strides = array<i32>} : memref<2x21xf32, #tpu.memory_space<vmem>>, vector<2x21xf32>,
    return
  }
}

</mosaic_0001>

<bundles_post_ra>
// kernel: ada_scheduler_forward_pallas.1
= control target key start
LH: loop header
LB: loop body
LE: loop exit
PB: predicated region body
PF: predicated region fallthrough
CT: control target
= control target key end

     0   :  { %15 = vsyncpa [#allocation3], 0  ;;  %s3254_s0 = inlined_call_operand.vmem [shape: bf16[2,16,896], index: 0, kind: input, shape index: {}]   ;;  %s3255_s1 = inlined_call_operand.vmem [shape: f32[2,1], index: 1, kind: input, shape index: {}]   ;;  %s3256_s2 = inlined_call_operand.hbm [shape: bf16[896,256], index: 2, kind: input, shape index: {}]   ;;  %s3257_s3 = inlined_call_operand.vmem [shape: f32[1,64], index: 3, kind: input, shape index: {}]   ;;  %s3258_s4 = inlined_call_operand.vmem [shape: f32[1,64], index: 4, kind: input, shape index: {}]   ;;  %s3259_s5 = inlined_call_operand.hbm [shape: bf16[256,512], index: 5, kind: input, shape index: {}]   ;;  %s3260_s6 = inlined_call_operand.vmem [shape: bf16[64,512], index: 6, kind: input, shape index: {}]   ;;  %s3261_s7 = inlined_call_operand.vmem [shape: bf16[512,64], index: 7, kind: input, shape index: {}]   ;;  %s3262_s8 = inlined_call_operand.vmem [shape: f32[64,21], index: 8, kind: input, shape index: {}]   ;;  %s3263_s9 = inlined_call_operand.vmem [shape: f32[1,21], index: 9, kind: input, shape index: {}]   ;;  %s3264_s10 = inlined_call_operand.hbm [shape: f32[2,21], index: 10, kind: output, shape index: {}]  }
   0x1   :  { %16 = vsyncpa [#allocation6], 0 }
   0x2   :  { %17 = vsyncpa [#allocation4], 0  ;;  %s2944_s13 = smov [#allocation2]  }
   0x3   :  { %s27_s14 = sshll.u32 %s2944_s13, 4  ;;  %s28_s14 = int_to_ptr.vmem [resolvable:$true] %s27_s14 }
   0x4   :  { %s2886_s15 = scalar_lea.vmem %s28_s14, 14336  ;;  %p2891_p1 = scmp.lt.s32.totalorder %s28_s14, %s28_s14 }
   0x5   :  { %p2887_p0 = scmp.ne.s32.totalorder %s28_s14, %s2886_s15  ;;  %p2892_p2 = scmp.lt.s32.totalorder %s2886_s15, %s2886_s15 }
   0x7   :  { %p2893_p3 = por %p2892_p2, %p2891_p1 }
   0x9   :  { %p2894_p4 = pnand %p2893_p3, %p2887_p0 }
   0xb   :  { %2897 = shalt.err (!%p2894_p4)
}
   0xc   :  { %s2945_s16 = smov 128   ;;  %s2946_s17 = smov 8  }
   0xd   :  { %33 = dma.hbm_to_vmem [thread:$0]  %s3256_s2, 14336, %s28_s14, [#allocation3], %s2945_s16, %s2945_s16, %s2946_s17  }
   0xe   :  { %s2947_s20 = smov [#allocation5]  }
   0xf   :  { %s43_s21 = sshll.u32 %s2947_s20, 4  ;;  %s44_s21 = int_to_ptr.vmem [resolvable:$true] %s43_s21 }
  0x10   :  { %s2906_s22 = scalar_lea.vmem %s44_s21, 8192  ;;  %p2911_p6 = scmp.lt.s32.totalorder %s44_s21, %s44_s21 }
  0x11   :  { %p2907_p5 = scmp.ne.s32.totalorder %s44_s21, %s2906_s22  ;;  %p2912_p7 = scmp.lt.s32.totalorder %s2906_s22, %s2906_s22 }
  0x13   :  { %p2913_p8 = por %p2912_p7, %p2911_p6 }
  0x15   :  { %p2914_p9 = pnand %p2913_p8, %p2907_p5 }
  0x17   :  { %2917 = shalt.err (!%p2914_p9)
}
  0x18   :  { %s2948_s23 = smov 256   ;;  %s2949_s24 = smov 16  }
  0x19   :  { %49 = dma.hbm_to_vmem [thread:$0]  %s3259_s5, 8192, %s44_s21, [#allocation6], %s2948_s23, %s2948_s23, %s2949_s24  }
  0x1a   :  { %2938 = dma.done.wait [#allocation3], 14336  }
  0x1b   :  { %2939 = vsyncadd [#allocation3], 4294952960 }
  0x1c   :  { %2940 = dma.done.wait [#allocation6], 8192  }
  0x1d   :  { %2941 = vsyncadd [#allocation6], 4294959104  ;;  %v2950_v0 = vmov 0   ;;  %v2558_v1 = vld [vmem:[#allocation2 + $0x74] ss:$8 sps:$4 sm:$0xff]   ;;  %v65_v49 = vld [vmem:[%s3254_s0] sm:$0xff] }
  0x1e   :  { %2557 = vset.pattern.permute.xlu0 %v2950_v0  ;;  %v2560_v2 = vld [vmem:[#allocation2 + $0x174] ss:$8 sps:$4 sm:$0xff]   ;;  %957 = vmatprep.subr.bf16.mxu0 %v2558_v1  ;;  %v2562_v3 = vld [vmem:[#allocation2 + $0x70] ss:$8 sps:$4 sm:$0xff]   ;;  %v2564_v5 = vld [vmem:[#allocation2 + $0x64] ss:$8 sps:$4 sm:$0xff]   ;;  %v81_v55 = vunpack.c.l.bf16 %v65_v49  ;;  %v82_v56 = vunpack.c.h.bf16 %v65_v49 }
  0x1f   :  { %v2563_v4 = vld [vmem:[#allocation2 + $0x170] ss:$8 sps:$4 sm:$0xff]   ;;  %998 = vmatprep.subr.bf16.mxu1 %v2560_v2  ;;  %958 = vmatpush1.bf16.msra.mxu0 %v2562_v3  ;;  %v2566_v6 = vld [vmem:[#allocation2 + $0x164] ss:$8 sps:$4 sm:$0xff]   ;;  %v2568_v7 = vld [vmem:[#allocation2 + $0x60] ss:$8 sps:$4 sm:$0xff]  }
  0x20   :  { %999 = vmatpush1.bf16.msra.mxu1 %v2563_v4  ;;  %959 = vmatprep.subr.bf16.mxu0 %v2564_v5  ;;  %v2569_v8 = vld [vmem:[#allocation2 + $0x160] ss:$8 sps:$4 sm:$0xff]   ;;  %v2570_v9 = vld [vmem:[#allocation2 + $0x54] ss:$8 sps:$4 sm:$0xff]   ;;  %v2574_v11 = vld [vmem:[#allocation2 + $0x50] ss:$8 sps:$4 sm:$0xff]  }
  0x21   :  { %1000 = vmatprep.subr.bf16.mxu1 %v2566_v6  ;;  %v2572_v10 = vld [vmem:[#allocation2 + $0x154] ss:$8 sps:$4 sm:$0xff]   ;;  %v2575_v12 = vld [vmem:[#allocation2 + $0x150] ss:$8 sps:$4 sm:$0xff]   ;;  %v2576_v13 = vld [vmem:[#allocation2 + $0x44] ss:$8 sps:$4 sm:$0xff]  }
  0x22   :  { %v2578_v14 = vld [vmem:[#allocation2 + $0x144] ss:$8 sps:$4 sm:$0xff]   ;;  %v2580_v15 = vld [vmem:[#allocation2 + $0x40] ss:$8 sps:$4 sm:$0xff]   ;;  %v2582_v17 = vld [vmem:[#allocation2 + $0x34] ss:$8 sps:$4 sm:$0xff]  }
  0x23   :  { %960 = vmatpush1.bf16.msra.mxu0 %v2568_v7  ;;  %v2581_v16 = vld [vmem:[#allocation2 + $0x140] ss:$8 sps:$4 sm:$0xff]   ;;  %v2584_v18 = vld [vmem:[#allocation2 + $0x134] ss:$8 sps:$4 sm:$0xff]   ;;  %v2586_v19 = vld [vmem:[#allocation2 + $0x30] ss:$8 sps:$4 sm:$0xff]  }
  0x24   :  { %1001 = vmatpush1.bf16.msra.mxu1 %v2569_v8  ;;  %961 = vmatprep.subr.bf16.mxu0 %v2570_v9  ;;  %v2587_v20 = vld [vmem:[#allocation2 + $0x130] ss:$8 sps:$4 sm:$0xff]   ;;  %v2588_v21 = vld [vmem:[#allocation2 + $0x24] ss:$8 sps:$4 sm:$0xff]   ;;  %v2592_v23 = vld [vmem:[#allocation2 + $0x20] ss:$8 sps:$4 sm:$0xff]  }
  0x25   :  { %1002 = vmatprep.subr.bf16.mxu1 %v2572_v10  ;;  %v2590_v22 = vld [vmem:[#allocation2 + $0x124] ss:$8 sps:$4 sm:$0xff]   ;;  %v2593_v24 = vld [vmem:[#allocation2 + $0x120] ss:$8 sps:$4 sm:$0xff]   ;;  %v2594_v25 = vld [vmem:[#allocation2 + $0x14] ss:$8 sps:$4 sm:$0xff]  }
  0x26   :  { %v2596_v26 = vld [vmem:[#allocation2 + $0x114] ss:$8 sps:$4 sm:$0xff]   ;;  %v2598_v27 = vld [vmem:[#allocation2 + $0x10] ss:$8 sps:$4 sm:$0xff]   ;;  %v2600_v29 = vld [vmem:[#allocation2 + $0x4] ss:$8 sps:$4 sm:$0xff]  }
  0x27   :  { %962 = vmatpush1.bf16.msra.mxu0 %v2574_v11  ;;  %v2599_v28 = vld [vmem:[#allocation2 + $0x110] ss:$8 sps:$4 sm:$0xff]   ;;  %v2602_v30 = vld [vmem:[#allocation2 + $0x104] ss:$8 sps:$4 sm:$0xff]   ;;  %v2604_v31 = vld [vmem:[#allocation2] ss:$8 sps:$4 sm:$0xff]  }
  0x28   :  { %1003 = vmatpush1.bf16.msra.mxu1 %v2575_v12  ;;  %963 = vmatprep.subr.bf16.mxu0 %v2576_v13  ;;  %v2605_v32 = vld [vmem:[#allocation2 + $0x100] ss:$8 sps:$4 sm:$0xff]   ;;  %v2606_v33 = vld [vmem:[#allocation2 + $0xf4] ss:$8 sps:$4 sm:$0xff]   ;;  %v2610_v35 = vld [vmem:[#allocation2 + $0xf0] ss:$8 sps:$4 sm:$0xff]  }
  0x29   :  { %1004 = vmatprep.subr.bf16.mxu1 %v2578_v14  ;;  %v2608_v34 = vld [vmem:[#allocation2 + $0x1f4] ss:$8 sps:$4 sm:$0xff]   ;;  %v2611_v36 = vld [vmem:[#allocation2 + $0x1f0] ss:$8 sps:$4 sm:$0xff]   ;;  %v2612_v37 = vld [vmem:[#allocation2 + $0xe4] ss:$8 sps:$4 sm:$0xff]  }
  0x2a   :  { %v2614_v38 = vld [vmem:[#allocation2 + $0x1e4] ss:$8 sps:$4 sm:$0xff]   ;;  %v2616_v39 = vld [vmem:[#allocation2 + $0xe0] ss:$8 sps:$4 sm:$0xff]   ;;  %v2618_v41 = vld [vmem:[#allocation2 + $0xd4] ss:$8 sps:$4 sm:$0xff]  }
  0x2b   :  { %964 = vmatpush1.bf16.msra.mxu0 %v2580_v15  ;;  %v2617_v40 = vld [vmem:[#allocation2 + $0x1e0] ss:$8 sps:$4 sm:$0xff]   ;;  %v2620_v42 = vld [vmem:[#allocation2 + $0x1d4] ss:$8 sps:$4 sm:$0xff]   ;;  %v2622_v43 = vld [vmem:[#allocation2 + $0xd0] ss:$8 sps:$4 sm:$0xff]  }
  0x2c   :  { %1005 = vmatpush1.bf16.msra.mxu1 %v2581_v16  ;;  %965 = vmatprep.subr.bf16.mxu0 %v2582_v17  ;;  %v2623_v44 = vld [vmem:[#allocation2 + $0x1d0] ss:$8 sps:$4 sm:$0xff]   ;;  %v2624_v45 = vld [vmem:[#allocation2 + $0xc4] ss:$8 sps:$4 sm:$0xff]   ;;  %v2628_v47 = vld [vmem:[#allocation2 + $0xc0] ss:$8 sps:$4 sm:$0xff]  }
  0x2d   :  { %1006 = vmatprep.subr.bf16.mxu1 %v2584_v18  ;;  %v2626_v46 = vld [vmem:[#allocation2 + $0x1c4] ss:$8 sps:$4 sm:$0xff]   ;;  %v2629_v48 = vld [vmem:[#allocation2 + $0x1c0] ss:$8 sps:$4 sm:$0xff]   ;;  %v2630_v50 = vld [vmem:[#allocation2 + $0xb4] ss:$8 sps:$4 sm:$0xff]  }
  0x2e   :  { %v2632_v51 = vld [vmem:[#allocation2 + $0x1b4] ss:$8 sps:$4 sm:$0xff]   ;;  %v66_v61 = vld [vmem:[%s3254_s0 + $0x8] sm:$0xff]  ;;  %v74_v63 = vld [vmem:[%s3254_s0 + $0x40] sm:$0xff]  ;;  %vm375_vm0 = vcmask 1041409   ;;  %vm1306_vm1 = vcmask 523264  }
  0x2f   :  { %966 = vmatpush1.bf16.msra.mxu0 %v2586_v19  ;;  %v69_v52 = vld [vmem:[%s3254_s0 + $0x1c] sm:$0xff]  ;;  %v77_v54 = vld [vmem:[%s3254_s0 + $0x54] sm:$0xff]  ;;  %v70_v62 = vld [vmem:[%s3254_s0 + $0x24] sm:$0xff]  ;;  %v83_v4 = vunpack.c.l.bf16 %v66_v61  ;;  %v84_v5 = vunpack.c.h.bf16 %v66_v61  ;;  %v97_v9 = vunpack.c.l.bf16 %v74_v63  ;;  %v98_v13 = vunpack.c.h.bf16 %v74_v63  ;;  %s2953_s20 = smov [#allocation7]  }
  0x30   :  { %1007 = vmatpush1.bf16.msra.mxu1 %v2587_v20  ;;  %967 = vmatprep.subr.bf16.mxu0 %v2588_v21  ;;  %v73_v53 = vld [vmem:[%s3254_s0 + $0x38] sm:$0xff]  ;;  %v88_v57 = vunpack.c.l.bf16 %v69_v52  ;;  %v89_v58 = vunpack.c.h.bf16 %v69_v52  ;;  %v102_v1 = vunpack.c.l.bf16 %v77_v54  ;;  %v103_v2 = vunpack.c.h.bf16 %v77_v54  ;;  %v2636_v16 = vld [vmem:[#allocation2 + $0xa4] ss:$8 sps:$4 sm:$0xff]  }
  0x31   :  { %1008 = vmatprep.subr.bf16.mxu1 %v2590_v22  ;;  %v95_v59 = vunpack.c.l.bf16 %v73_v53  ;;  %v96_v60 = vunpack.c.h.bf16 %v73_v53  ;;  %v78_v3 = vld [vmem:[%s3254_s0 + $0x5c] sm:$0xff]  ;;  %v90_v7 = vunpack.c.l.bf16 %v70_v62  ;;  %v91_v8 = vunpack.c.h.bf16 %v70_v62  ;;  %v2634_v10 = vld [vmem:[#allocation2 + $0xb0] ss:$8 sps:$4 sm:$0xff]   ;;  %v2638_v21 = vld [vmem:[#allocation2 + $0x1a4] ss:$8 sps:$4 sm:$0xff]  }
  0x32   :  { %v116_v6 = vadd.f32 %v89_v58, %v82_v56  ;;  %v2635_v11 = vld [vmem:[#allocation2 + $0x1b0] ss:$8 sps:$4 sm:$0xff]   ;;  %v104_v14 = vunpack.c.l.bf16 %v78_v3  ;;  %v105_v15 = vunpack.c.h.bf16 %v78_v3  ;;  %v109_v19 = vadd.f32 %v88_v57, %v81_v55  ;;  %v2650_v61 = vld [vmem:[#allocation2 + $0x184] ss:$8 sps:$4 sm:$0xff]  }
  0x33   :  { %968 = vmatpush1.bf16.msra.mxu0 %v2592_v23  ;;  %v165_v12 = vadd.f32 %v103_v2, %v96_v60  ;;  %v130_v18 = vadd.f32 %v91_v8, %v84_v5  ;;  %v158_v20 = vadd.f32 %v102_v1, %v95_v59  ;;  %v2646_v54 = vld [vmem:[#allocation2 + $0x90] ss:$8 sps:$4 sm:$0xff]   ;;  %v2648_v60 = vld [vmem:[#allocation2 + $0x84] ss:$8 sps:$4 sm:$0xff]   ;;  %vm2952_vm2 = vmmov 0  }
  0x34   :  { %1009 = vmatpush1.bf16.msra.mxu1 %v2593_v24  ;;  %969 = vmatprep.subr.bf16.mxu0 %v2594_v25  ;;  %v117_v17 = vrot.slane %v116_v6, 4  ;;  %v179_v23 = vadd.f32 %v105_v15, %v98_v13  ;;  %v123_v24 = vadd.f32 %v90_v7, %v83_v4  ;;  %v172_v25 = vadd.f32 %v104_v14, %v97_v9  ;;  %v2647_v55 = vld [vmem:[#allocation2 + $0x190] ss:$8 sps:$4 sm:$0xff]   ;;  %v2652_v7 = vld [vmem:[#allocation2 + $0x80] ss:$8 sps:$4 sm:$0xff]  }
  0x35   :  { %1010 = vmatprep.subr.bf16.mxu1 %v2596_v26  ;;  %v166_v22 = vrot.slane %v165_v12, 4  ;;  %vm2227_vm3 = vcmask 164864  }
  0x36   :  { %v118_v26 = vadd.f32 %v117_v17, %v116_v6 }
  0x37   :  { %970 = vmatpush1.bf16.msra.mxu0 %v2598_v27  ;;  %v131_v27 = vrot.slane %v130_v18, 4 }
  0x38   :  { %1011 = vmatpush1.bf16.msra.mxu1 %v2599_v28  ;;  %971 = vmatprep.subr.bf16.mxu0 %v2600_v29  ;;  %v110_v28 = vrot.slane %v109_v19, 4  ;;  %v159_v29 = vrot.slane %v158_v20, 4 }
  0x39   :  { %1012 = vmatprep.subr.bf16.mxu1 %v2602_v30  ;;  %v167_v30 = vadd.f32 %v166_v22, %v165_v12  ;;  %v2653_v12 = vld [vmem:[#allocation2 + $0x180] ss:$8 sps:$4 sm:$0xff]   ;;  %v2680_v22 = vld [vmem:[#allocation2 + $0x374] ss:$8 sps:$4 sm:$0xff]  }
  0x3b   :  { %972 = vmatpush1.bf16.msra.mxu0 %v2604_v31  ;;  %v180_v31 = vrot.slane %v179_v23, 4 }
  0x3c   :  { %1013 = vmatpush1.bf16.msra.mxu1 %v2605_v32  ;;  %973 = vmatprep.subr.bf16.mxu0 %v2606_v33  ;;  %v124_v32 = vrot.slane %v123_v24, 4  ;;  %v173_v33 = vrot.slane %v172_v25, 4 }
  0x3d   :  { %1014 = vmatprep.subr.bf16.mxu1 %v2608_v34  ;;  %v2640_v34 = vld [vmem:[#allocation2 + $0xa0] ss:$8 sps:$4 sm:$0xff]  }
  0x3f   :  { %974 = vmatpush2.bf16.msra.mxu0 %v2610_v35  ;;  %v2641_v35 = vld [vmem:[#allocation2 + $0x1a0] ss:$8 sps:$4 sm:$0xff]  }
  0x40   :  { %1015 = vmatpush2.bf16.msra.mxu1 %v2611_v36  ;;  %975 = vmatprep.subr.bf16.mxu0 %v2612_v37  ;;  %v119_v36 = vrot.slane %v118_v26, 2  ;;  %v132_v37 = vadd.f32 %v131_v27, %v130_v18  ;;  %v1121_v27 = vld [vmem:[%s3255_s1] sm:$0x3] }
  0x41   :  { %1016 = vmatprep.subr.bf16.mxu1 %v2614_v38  ;;  %v111_v38 = vadd.f32 %v110_v28, %v109_v19  ;;  %1125 = vperm.xlu0 %2557, %v1121_v27  }
  0x43   :  { %976 = vmatpush2.bf16.msra.mxu0 %v2616_v39  ;;  %v160_v39 = vadd.f32 %v159_v29, %v158_v20 }
  0x44   :  { %1017 = vmatpush2.bf16.msra.mxu1 %v2617_v40  ;;  %977 = vmatprep.subr.bf16.mxu0 %v2618_v41  ;;  %v2642_v40 = vld [vmem:[#allocation2 + $0x94] ss:$8 sps:$4 sm:$0xff]  }
  0x45   :  { %1018 = vmatprep.subr.bf16.mxu1 %v2620_v42  ;;  %v2644_v41 = vld [vmem:[#allocation2 + $0x194] ss:$8 sps:$4 sm:$0xff]   ;;  %v168_v42 = vrot.slane %v167_v30, 2  ;;  %v161_v49 = vrot.slane %v160_v39, 2 }
  0x47   :  { %978 = vmatpush2.bf16.msra.mxu0 %v2622_v43  ;;  %v181_v43 = vadd.f32 %v180_v31, %v179_v23  ;;  %v162_v59 = vadd.f32 %v161_v49, %v160_v39  ;;  %v2654_v49 = vld [vmem:[#allocation2 + $0x270] ss:$8 sps:$4 sm:$0xff]  }
  0x48   :  { %1019 = vmatpush2.bf16.msra.mxu1 %v2623_v44  ;;  %979 = vmatprep.subr.bf16.mxu0 %v2624_v45  ;;  %v125_v44 = vadd.f32 %v124_v32, %v123_v24  ;;  %v174_v45 = vadd.f32 %v173_v33, %v172_v25 }
  0x49   :  { %1020 = vmatprep.subr.bf16.mxu1 %v2626_v46  ;;  %v120_v46 = vadd.f32 %v119_v36, %v118_v26  ;;  %v163_v6 = vrot.slane %v162_v59, 1 }
  0x4a   :  { %v126_v52 = vrot.slane %v125_v44, 2  ;;  %v175_v53 = vrot.slane %v174_v45, 2 }
  0x4b   :  { %980 = vmatpush2.bf16.msra.mxu0 %v2628_v47  ;;  %v133_v47 = vrot.slane %v132_v37, 2  ;;  %v121_v56 = vrot.slane %v120_v46, 1 }
  0x4c   :  { %1021 = vmatpush2.bf16.msra.mxu1 %v2629_v48  ;;  %981 = vmatprep.subr.bf16.mxu0 %v2630_v50  ;;  %v112_v48 = vrot.slane %v111_v38, 2  ;;  %v169_v50 = vadd.f32 %v168_v42, %v167_v30  ;;  %v127_v1 = vadd.f32 %v126_v52, %v125_v44  ;;  %v176_v2 = vadd.f32 %v175_v53, %v174_v45  ;;  %v2659_v53 = vld [vmem:[#allocation2 + $0x264] ss:$8 sps:$4 sm:$0xff]  }
  0x4d   :  { %1022 = vmatprep.subr.bf16.mxu1 %v2632_v51  ;;  %v182_v51 = vrot.slane %v181_v43, 2  ;;  %v134_v57 = vadd.f32 %v133_v47, %v132_v37  ;;  %v122_v3 = vadd.f32 %v121_v56, %v120_v46  ;;  %v2678_v56 = vld [vmem:[#allocation2 + $0x370] ss:$8 sps:$4 sm:$0xff]  }
  0x4e   :  { %v113_v58 = vadd.f32 %v112_v48, %v111_v38  ;;  %v170_v62 = vrot.slane %v169_v50, 1 }
  0x4f   :  { %982 = vmatpush2.bf16.msra.mxu0 %v2634_v10  ;;  %v183_v63 = vadd.f32 %v182_v51, %v181_v43  ;;  %v135_v4 = vrot.slane %v134_v57, 1  ;;  %v128_v10 = vrot.slane %v127_v1, 1  ;;  %v208_v13 = vmul.f32 0.0625, %v122_v3  ;;  %v2668_v3 = vld [vmem:[#allocation2 + $0x234] ss:$8 sps:$4 sm:$0xff]  }
  0x50   :  { %1023 = vmatpush2.bf16.msra.mxu1 %v2635_v11  ;;  %983 = vmatprep.subr.bf16.mxu0 %v2636_v16  ;;  %v114_v5 = vrot.slane %v113_v58, 1  ;;  %v171_v8 = vadd.f32 %v170_v62, %v169_v50  ;;  %v177_v11 = vrot.slane %v176_v2, 1  ;;  %v164_v16 = vadd.f32 %v163_v6, %v162_v59  ;;  %v2662_v59 = vld [vmem:[#allocation2 + $0x254] ss:$8 sps:$4 sm:$0xff]   ;;  %v2660_v62 = vld [vmem:[#allocation2 + $0x250] ss:$8 sps:$4 sm:$0xff]  }
  0x51   :  { %1024 = vmatprep.subr.bf16.mxu1 %v2638_v21  ;;  %v184_v9 = vrot.slane %v183_v63, 1  ;;  %v136_v14 = vadd.f32 %v135_v4, %v134_v57  ;;  %v129_v19 = vadd.f32 %v128_v10, %v127_v1  ;;  %v2656_v21 = vld [vmem:[#allocation2 + $0x274] ss:$8 sps:$4 sm:$0xff]   ;;  %v222_v23 = vpack.c.bf16 %v208_v13, %v208_v13  ;;  %v2686_v57 = vld [vmem:[#allocation2 + $0x364] ss:$8 sps:$4 sm:$0xff]  }
  0x52   :  { %v115_v15 = vadd.f32 %v114_v5, %v113_v58  ;;  %v215_v17 = vmul.f32 0.0625, %v171_v8  ;;  %v178_v20 = vadd.f32 %v177_v11, %v176_v2  ;;  %v214_v26 = vmul.f32 0.0625, %v164_v16  ;;  %v2657_v58 = vld [vmem:[#allocation2 + $0x260] ss:$8 sps:$4 sm:$0xff]   ;;  %v2690_v2 = vld [vmem:[#allocation2 + $0x350] ss:$8 sps:$4 sm:$0xff]  }
  0x53   :  { %984 = vmatpush2.bf16.msra.mxu0 %v2640_v34  ;;  %v185_v18 = vadd.f32 %v184_v9, %v183_v63  ;;  %v210_v24 = vmul.f32 0.0625, %v136_v14  ;;  %v209_v30 = vmul.f32 0.0625, %v129_v19  ;;  %v362_v32 = vunpack.c.l.b16 %v222_v23  ;;  %v2665_v63 = vld [vmem:[#allocation2 + $0x244] ss:$8 sps:$4 sm:$0xff]   ;;  %v2663_v1 = vld [vmem:[#allocation2 + $0x240] ss:$8 sps:$4 sm:$0xff]  }
  0x54   :  { %1025 = vmatpush2.bf16.msra.mxu1 %v2641_v35  ;;  %985 = vmatprep.subr.bf16.mxu0 %v2642_v40  ;;  %v207_v25 = vmul.f32 0.0625, %v115_v15  ;;  %v229_v28 = vpack.c.bf16 %v215_v17, %v215_v17  ;;  %v216_v31 = vmul.f32 0.0625, %v178_v20  ;;  %v228_v35 = vpack.c.bf16 %v214_v26, %v214_v26  ;;  %v2698_v4 = vld [vmem:[#allocation2 + $0x344] ss:$8 sps:$4 sm:$0xff]   ;;  %v68_v5 = vld [vmem:[%s3254_s0 + $0x18] ss:$28 sps:$4 sm:$0xff]  }
  0x55   :  { %1026 = vmatprep.subr.bf16.mxu1 %v2644_v41  ;;  %v217_v29 = vmul.f32 0.0625, %v185_v18  ;;  %v224_v33 = vpack.c.bf16 %v210_v24, %v210_v24  ;;  %v223_v38 = vpack.c.bf16 %v209_v30, %v209_v30  ;;  %v76_v6 = vld [vmem:[%s3254_s0 + $0x50] ss:$28 sps:$4 sm:$0xff]   ;;  %v87_v8 = vunpack.c.l.bf16 %v68_v5  ;;  %v79_v14 = vld [vmem:[%s3254_s0 + $0x64] sm:$0xff]  ;;  %v2704_v20 = vld [vmem:[#allocation2 + $0x334] ss:$8 sps:$4 sm:$0xff]  }
  0x56   :  { %v221_v34 = vpack.c.bf16 %v207_v25, %v207_v25  ;;  %v369_v36 = vunpack.c.l.b16 %v229_v28  ;;  %v230_v39 = vpack.c.bf16 %v216_v31, %v216_v31  ;;  %v368_v42 = vunpack.c.l.b16 %v228_v35  ;;  %v75_v13 = vld [vmem:[%s3254_s0 + $0x48] sm:$0xff]  ;;  %v2666_v25 = vld [vmem:[#allocation2 + $0x230] ss:$8 sps:$4 sm:$0xff]  }
  0x57   :  { %986 = vmatpush2.bf16.msra.mxu0 %v2646_v54  ;;  %v231_v37 = vpack.c.bf16 %v217_v29, %v217_v29  ;;  %v364_v40 = vunpack.c.l.b16 %v224_v33  ;;  %v363_v45 = vunpack.c.l.b16 %v223_v38  ;;  %v94_v9 = vunpack.c.h.bf16 %v68_v5  ;;  %v2696_v15 = vld [vmem:[#allocation2 + $0x340] ss:$8 sps:$4 sm:$0xff]   ;;  %v2671_v29 = vld [vmem:[#allocation2 + $0x224] ss:$8 sps:$4 sm:$0xff]  }
  0x58   :  { %1027 = vmatpush2.bf16.msra.mxu1 %v2647_v55  ;;  %987 = vmatprep.subr.bf16.mxu0 %v2648_v60  ;;  %v361_v41 = vunpack.c.l.b16 %v221_v34  ;;  %v377_v43 = vsel %vm375_vm0, %v369_v36, %v362_v32  ;;  %v370_v46 = vunpack.c.l.b16 %v230_v39  ;;  %v2684_v60 = vld [vmem:[#allocation2 + $0x360] ss:$8 sps:$4 sm:$0xff]   ;;  %v101_v10 = vunpack.c.l.bf16 %v76_v6  ;;  %v2702_v32 = vld [vmem:[#allocation2 + $0x330] ss:$8 sps:$4 sm:$0xff]   ;;  %v2710_v35 = vld [vmem:[#allocation2 + $0x324] ss:$8 sps:$4 sm:$0xff]  }
  0x59   :  { %1028 = vmatprep.subr.bf16.mxu1 %v2650_v61  ;;  %v371_v44 = vunpack.c.l.b16 %v231_v37  ;;  %v384_v47 = vpack.c.b16 %v377_v43, %v377_v43  ;;  %v2692_v61 = vld [vmem:[#allocation2 + $0x354] ss:$8 sps:$4 sm:$0xff]   ;;  %v108_v11 = vunpack.c.h.bf16 %v76_v6  ;;  %v99_v23 = vunpack.c.l.bf16 %v75_v13 }
  0x5a   :  { %v376_v48 = vsel %vm375_vm0, %v368_v42, %v361_v41  ;;  %v378_v52 = vsel %vm375_vm0, %v370_v46, %v363_v45  ;;  %v100_v24 = vunpack.c.h.bf16 %v75_v13  ;;  %v106_v26 = vunpack.c.l.bf16 %v79_v14  ;;  %v2674_v43 = vld [vmem:[#allocation2 + $0x214] ss:$8 sps:$4 sm:$0xff]   ;;  %v2708_v46 = vld [vmem:[#allocation2 + $0x320] ss:$8 sps:$4 sm:$0xff]   ;;  %v2681_v13 = vld [vmem:[#allocation2 + $0x2f0] ss:$8 sps:$4 sm:$0xff]  }
  0x5b   :  { %988 = vmatpush2.bf16.msra.mxu0 %v2652_v7  ;;  %v379_v50 = vsel %vm375_vm0, %v371_v44, %v364_v40  ;;  %v383_v51 = vpack.c.b16 %v376_v48, %v376_v48  ;;  %989 = vmatprep.mubr.bf16.mxu0 %v384_v47  ;;  %v385_v55 = vpack.c.b16 %v378_v52, %v378_v52  ;;  %v67_v7 = vld [vmem:[%s3254_s0 + $0x10] sm:$0xff]  ;;  %v107_v27 = vunpack.c.h.bf16 %v79_v14  ;;  %v2669_v40 = vld [vmem:[#allocation2 + $0x220] ss:$8 sps:$4 sm:$0xff]  }
  0x5c   :  { %1029 = vmatpush2.bf16.msra.mxu1 %v2653_v12  ;;  %1039 = vmatprep.subr.bf16.mxu0 %v2656_v21  ;;  %v386_v54 = vpack.c.b16 %v379_v50, %v379_v50  ;;  %v71_v12 = vld [vmem:[%s3254_s0 + $0x2c] sm:$0xff]  ;;  %v85_v16 = vunpack.c.l.bf16 %v67_v7  ;;  %v86_v17 = vunpack.c.h.bf16 %v67_v7  ;;  %v151_v21 = vadd.f32 %v94_v9, %v87_v8  ;;  %v2720_v7 = vld [vmem:[#allocation2 + $0x300] ss:$8 sps:$4 sm:$0xff]  }
  0x5d   :  { %1080 = vmatprep.subr.bf16.mxu1 %v2680_v22  ;;  %v92_v18 = vunpack.c.l.bf16 %v71_v12  ;;  %v93_v19 = vunpack.c.h.bf16 %v71_v12  ;;  %v200_v22 = vadd.f32 %v108_v11, %v101_v10  ;;  %v193_v34 = vadd.f32 %v107_v27, %v100_v24  ;;  %v2728_v12 = vld [vmem:[%s3260_s6 + $0x64] ss:$16 sps:$4 sm:$0xff]  }
  0x5e   :  { %990 = vmatmul.mubr.bf16.vlgmr.msra.gmra.mxu0 %v383_v51  ;;  %1030 = vmatprep.mubr.bf16.mxu1 %v386_v54  ;;  %v152_v30 = vrot.slane %v151_v21, 4  ;;  %v186_v39 = vadd.f32 %v106_v26, %v99_v23  ;;  %v2672_v54 = vld [vmem:[#allocation2 + $0x210] ss:$8 sps:$4 sm:$0xff]   ;;  %v2687_v26 = vld [vmem:[#allocation2 + $0x2e0] ss:$8 sps:$4 sm:$0xff]  }
  0x5f   :  { %1040 = vmatpush1.bf16.msra.mxu0 %v2654_v49  ;;  %1031 = vmatmul.mubr.bf16.vlgmr.msra.gmra.mxu1 %v385_v55  ;;  %v144_v28 = vadd.f32 %v93_v19, %v86_v17  ;;  %v201_v31 = vrot.slane %v200_v22, 4  ;;  %v137_v38 = vadd.f32 %v92_v18, %v85_v16  ;;  %v194_v42 = vrot.slane %v193_v34, 4  ;;  %v2716_v49 = vld [vmem:[#allocation2 + $0x314] ss:$8 sps:$4 sm:$0xff]   ;;  %v2677_v55 = vld [vmem:[#allocation2 + $0x204] ss:$8 sps:$4 sm:$0xff]  }
  0x60   :  { %1041 = vmatprep.subr.bf16.mxu0 %v2659_v53  ;;  %1081 = vmatpush1.bf16.msra.mxu1 %v2678_v56  ;;  %v153_v36 = vadd.f32 %v152_v30, %v151_v21  ;;  %v187_v53 = vrot.slane %v186_v39, 4  ;;  %v2689_v16 = vld [vmem:[#allocation2 + $0x2e4] ss:$8 sps:$4 sm:$0xff]   ;;  %v2695_v30 = vld [vmem:[#allocation2 + $0x2d4] ss:$8 sps:$4 sm:$0xff]  }
  0x61   :  { %1112 = vmatprep.mubr.bf16.mxu1 %v2950_v0  ;;  %1082 = vmatprep.subr.bf16.mxu1 %v2686_v57  ;;  %v145_v33 = vrot.slane %v144_v28, 4  ;;  %v202_v37 = vadd.f32 %v201_v31, %v200_v22  ;;  %v195_v48 = vadd.f32 %v194_v42, %v193_v34  ;;  %v138_v52 = vrot.slane %v137_v38, 4 }
  0x62   :  { %v154_v44 = vrot.slane %v153_v36, 2  ;;  %v188_v6 = vadd.f32 %v187_v53, %v186_v39  ;;  %v2734_v39 = vld [vmem:[%s3260_s6 + $0x24] ss:$16 sps:$4 sm:$0xff]  }
  0x63   :  { %1042 = vmatpush1.bf16.msra.mxu0 %v2657_v58  ;;  %v146_v41 = vadd.f32 %v145_v33, %v144_v28  ;;  %v203_v45 = vrot.slane %v202_v37, 2  ;;  %v196_v57 = vrot.slane %v195_v48, 2  ;;  %v2714_v58 = vld [vmem:[#allocation2 + $0x310] ss:$8 sps:$4 sm:$0xff]   ;;  %v139_v5 = vadd.f32 %v138_v52, %v137_v38  ;;  %v2740_v52 = vld [vmem:[%s3260_s6 + $0x6c] ss:$16 sps:$4 sm:$0xff]  }
  0x64   :  { %1043 = vmatprep.subr.bf16.mxu0 %v2662_v59  ;;  %1083 = vmatpush1.bf16.msra.mxu1 %v2684_v60  ;;  %v155_v50 = vadd.f32 %v154_v44, %v153_v36  ;;  %v2729_v36 = vld [vmem:[%s3260_s6 + $0x40] ss:$16 sps:$4 sm:$0xff]   ;;  %v2713_v53 = vld [vmem:[#allocation2 + $0x2a4] ss:$8 sps:$4 sm:$0xff]  }
  0x65   :  { %1084 = vmatprep.subr.bf16.mxu1 %v2692_v61  ;;  %v147_v47 = vrot.slane %v146_v41, 2  ;;  %v204_v51 = vadd.f32 %v203_v45, %v202_v37  ;;  %v2675_v61 = vld [vmem:[#allocation2 + $0x200] ss:$8 sps:$4 sm:$0xff]   ;;  %v140_v19 = vrot.slane %v139_v5, 2  ;;  %v2693_v37 = vld [vmem:[#allocation2 + $0x2d0] ss:$8 sps:$4 sm:$0xff]  }
  0x66   :  { %v156_v59 = vrot.slane %v155_v50, 1  ;;  %v2732_v44 = vld [vmem:[%s3260_s6 + $0x20] ss:$16 sps:$4 sm:$0xff]  }
  0x67   :  { %1044 = vmatpush1.bf16.msra.mxu0 %v2660_v62  ;;  %v148_v56 = vadd.f32 %v147_v47, %v146_v41  ;;  %v205_v60 = vrot.slane %v204_v51, 1  ;;  %v2722_v62 = vld [vmem:[#allocation2 + $0x304] ss:$8 sps:$4 sm:$0xff]   ;;  %v2699_v45 = vld [vmem:[#allocation2 + $0x2c0] ss:$8 sps:$4 sm:$0xff]  }
  0x68   :  { %1045 = vmatprep.subr.bf16.mxu0 %v2665_v63  ;;  %1085 = vmatpush1.bf16.msra.mxu1 %v2690_v2  ;;  %v2683_v2 = vld [vmem:[#allocation2 + $0x2f4] ss:$8 sps:$4 sm:$0xff]  }
  0x69   :  { %1086 = vmatprep.subr.bf16.mxu1 %v2698_v4  ;;  %v149_v63 = vrot.slane %v148_v56, 1  ;;  %v206_v4 = vadd.f32 %v205_v60, %v204_v51  ;;  %v2707_v47 = vld [vmem:[#allocation2 + $0x2b4] ss:$8 sps:$4 sm:$0xff]   ;;  %v2705_v51 = vld [vmem:[#allocation2 + $0x2b0] ss:$8 sps:$4 sm:$0xff]  }
  0x6a   :  { %v2717_v60 = vld [vmem:[#allocation2 + $0x290] ss:$8 sps:$4 sm:$0xff]  }
  0x6b   :  { %1046 = vmatpush1.bf16.msra.mxu0 %v2663_v1  ;;  %v197_v1 = vadd.f32 %v196_v57, %v195_v48  ;;  %v150_v8 = vadd.f32 %v149_v63, %v148_v56  ;;  %v220_v11 = vmul.f32 0.0625, %v206_v4  ;;  %v2711_v56 = vld [vmem:[#allocation2 + $0x2a0] ss:$8 sps:$4 sm:$0xff]   ;;  %v2719_v57 = vld [vmem:[#allocation2 + $0x294] ss:$8 sps:$4 sm:$0xff]  }
  0x6c   :  { %1047 = vmatprep.subr.bf16.mxu0 %v2668_v3  ;;  %1087 = vmatpush1.bf16.msra.mxu1 %v2696_v15  ;;  %v157_v3 = vadd.f32 %v156_v59, %v155_v50  ;;  %v2735_v50 = vld [vmem:[%s3260_s6] ss:$16 sps:$4 sm:$0xff]  }
  0x6d   :  { %1088 = vmatprep.subr.bf16.mxu1 %v2704_v20  ;;  %v198_v9 = vrot.slane %v197_v1, 1  ;;  %v212_v15 = vmul.f32 0.0625, %v150_v8  ;;  %v234_v18 = vpack.c.bf16 %v220_v11, %v220_v11  ;;  %v189_v20 = vrot.slane %v188_v6, 2  ;;  %v2750_v4 = vld [vmem:[#allocation5 + $0xe0] ss:$16 sps:$4 sm:$0xff]  }
  0x6e   :  { %v213_v10 = vmul.f32 0.0625, %v157_v3  ;;  %v2764_v8 = vld [vmem:[#allocation5 + $0xa4] ss:$16 sps:$4 sm:$0xff]   ;;  %v2768_v11 = vld [vmem:[#allocation5 + $0x80] ss:$16 sps:$4 sm:$0xff]  }
  0x6f   :  { %1048 = vmatpush1.bf16.msra.mxu0 %v2666_v25  ;;  %v199_v14 = vadd.f32 %v198_v9, %v197_v1  ;;  %v226_v22 = vpack.c.bf16 %v212_v15, %v212_v15  ;;  %v374_v24 = vunpack.c.l.b16 %v234_v18  ;;  %v2726_v25 = vld [vmem:[%s3260_s6 + $0x60] ss:$16 sps:$4 sm:$0xff]   ;;  %v190_v33 = vadd.f32 %v189_v20, %v188_v6  ;;  %v2758_v6 = vld [vmem:[#allocation5 + $0xc4] ss:$16 sps:$4 sm:$0xff]  }
  0x70   :  { %1049 = vmatprep.subr.bf16.mxu0 %v2671_v29  ;;  %1089 = vmatpush1.bf16.msra.mxu1 %v2702_v32  ;;  %v227_v17 = vpack.c.bf16 %v213_v10, %v213_v10  ;;  %v2731_v29 = vld [vmem:[%s3260_s6 + $0x44] ss:$16 sps:$4 sm:$0xff]   ;;  %v141_v32 = vadd.f32 %v140_v19, %v139_v5  ;;  %v2723_v1 = vld [vmem:[#allocation2 + $0x280] ss:$8 sps:$4 sm:$0xff]  }
  0x71   :  { %1090 = vmatprep.subr.bf16.mxu1 %v2710_v35  ;;  %v219_v21 = vmul.f32 0.0625, %v199_v14  ;;  %v366_v28 = vunpack.c.l.b16 %v226_v22  ;;  %v2752_v5 = vld [vmem:[#allocation5 + $0xe4] ss:$16 sps:$4 sm:$0xff]   ;;  %v2762_v9 = vld [vmem:[#allocation5 + $0xa0] ss:$16 sps:$4 sm:$0xff]  }
  0x72   :  { %v367_v23 = vunpack.c.l.b16 %v227_v17  ;;  %v142_v42 = vrot.slane %v141_v32, 1  ;;  %v2770_v10 = vld [vmem:[#allocation5 + $0x84] ss:$16 sps:$4 sm:$0xff]   ;;  %v2780_v15 = vld [vmem:[#allocation5 + $0x40] ss:$16 sps:$4 sm:$0xff]  }
  0x73   :  { %1050 = vmatpush1.bf16.msra.mxu0 %v2669_v40  ;;  %v233_v27 = vpack.c.bf16 %v219_v21, %v219_v21  ;;  %v2701_v40 = vld [vmem:[#allocation2 + $0x2c4] ss:$8 sps:$4 sm:$0xff]   ;;  %v2786_v17 = vld [vmem:[#allocation5 + $0x20] ss:$16 sps:$4 sm:$0xff]  }
  0x74   :  { %1051 = vmatprep.subr.bf16.mxu0 %v2674_v43  ;;  %1091 = vmatpush1.bf16.msra.mxu1 %v2708_v46  ;;  %v382_v31 = vsel %vm375_vm0, %v374_v24, %v367_v23  ;;  %v191_v43 = vrot.slane %v190_v33, 1  ;;  %v2737_v46 = vld [vmem:[%s3260_s6 + $0x4] ss:$16 sps:$4 sm:$0xff]   ;;  %v143_v48 = vadd.f32 %v142_v42, %v141_v32  ;;  %v2792_v19 = vld [vmem:[#allocation5] ss:$16 sps:$4 sm:$0xff]  }
  0x75   :  { %1092 = vmatprep.subr.bf16.mxu1 %v2716_v49  ;;  %v389_v34 = vpack.c.b16 %v382_v31, %v382_v31  ;;  %v373_v35 = vunpack.c.l.b16 %v233_v27  ;;  %v2782_v14 = vld [vmem:[#allocation5 + $0x44] ss:$16 sps:$4 sm:$0xff]   ;;  %v2798_v21 = vld [vmem:[#allocation5 + $0x1e0] ss:$16 sps:$4 sm:$0xff]   ;;  %v2744_v42 = vld [vmem:[%s3260_s6 + $0x28] ss:$16 sps:$4 sm:$0xff]  }
  0x76   :  { %v192_v49 = vadd.f32 %v191_v43, %v190_v33  ;;  %v2794_v18 = vld [vmem:[#allocation5 + $0x4] ss:$16 sps:$4 sm:$0xff]   ;;  %v2804_v23 = vld [vmem:[#allocation5 + $0x1c0] ss:$16 sps:$4 sm:$0xff]   ;;  %v2749_v43 = vld [vmem:[%s3260_s6 + $0xc] ss:$16 sps:$4 sm:$0xff]  }
  0x77   :  { %1052 = vmatpush1.bf16.msra.mxu0 %v2672_v54  ;;  %v381_v38 = vsel %vm375_vm0, %v373_v35, %v366_v28  ;;  %v211_v54 = vmul.f32 0.0625, %v143_v48  ;;  %v2800_v20 = vld [vmem:[#allocation5 + $0x1e4] ss:$16 sps:$4 sm:$0xff]   ;;  %v2357_v27 = vld [vmem:[%s3257_s3] ss:$0 sm:$0xff] }
  0x78   :  { %1053 = vmatprep.subr.bf16.mxu0 %v2677_v55  ;;  %1093 = vmatpush1.bf16.msra.mxu1 %v2714_v58  ;;  %v388_v41 = vpack.c.b16 %v381_v38, %v381_v38  ;;  %v218_v55 = vmul.f32 0.0625, %v192_v49  ;;  %v2806_v22 = vld [vmem:[#allocation5 + $0x1c4] ss:$16 sps:$4 sm:$0xff]   ;;  %v2816_v28 = vld [vmem:[#allocation5 + $0x180] ss:$16 sps:$4 sm:$0xff]  }
  0x79   :  { %1094 = vmatprep.subr.bf16.mxu1 %v2722_v62  ;;  %v225_v58 = vpack.c.bf16 %v211_v54, %v211_v54  ;;  %v2812_v24 = vld [vmem:[#allocation5 + $0x1a4] ss:$16 sps:$4 sm:$0xff]   ;;  %v2822_v33 = vld [vmem:[#allocation5 + $0x160] ss:$16 sps:$4 sm:$0xff]   ;;  %v2743_v38 = vld [vmem:[%s3260_s6 + $0x4c] ss:$16 sps:$4 sm:$0xff]  }
  0x7a   :  { %1071 = vmatprep.mubr.bf16.mxu0 %v388_v41  ;;  %v232_v59 = vpack.c.bf16 %v218_v55, %v218_v55  ;;  %v2830_v35 = vld [vmem:[#allocation5 + $0x144] ss:$16 sps:$4 sm:$0xff]   ;;  %v2746_v41 = vld [vmem:[%s3260_s6 + $0x2c] ss:$16 sps:$4 sm:$0xff]   ;;  %v2753_v48 = vld [vmem:[#allocation5 + $0xe8] ss:$16 sps:$4 sm:$0xff]  }
  0x7b   :  { %1054 = vmatpush1.bf16.msra.mxu0 %v2675_v61  ;;  %v2725_v61 = vld [vmem:[#allocation2 + $0x284] ss:$8 sps:$4 sm:$0xff]   ;;  %v365_v62 = vunpack.c.l.b16 %v225_v58  ;;  %v2840_v49 = vld [vmem:[#allocation5 + $0x100] ss:$16 sps:$4 sm:$0xff]   ;;  %v2771_v55 = vld [vmem:[#allocation5 + $0x88] ss:$16 sps:$4 sm:$0xff]  }
  0x7c   :  { %1055 = vmatprep.subr.bf16.mxu0 %v2683_v2  ;;  %1095 = vmatpush1.bf16.msra.mxu1 %v2720_v7  ;;  %v372_v63 = vunpack.c.l.b16 %v232_v59  ;;  %v2756_v7 = vld [vmem:[#allocation5 + $0xc0] ss:$16 sps:$4 sm:$0xff]   ;;  %v2773_v54 = vld [vmem:[#allocation5 + $0x8c] ss:$16 sps:$4 sm:$0xff]   ;;  %v2783_v59 = vld [vmem:[#allocation5 + $0x48] ss:$16 sps:$4 sm:$0xff]  }
  0x7d   :  { %1318 = vmatprep.subr.bf16.mxu1 %v2728_v12  ;;  %v2776_v12 = vld [vmem:[#allocation5 + $0x64] ss:$16 sps:$4 sm:$0xff]   ;;  %v2785_v58 = vld [vmem:[#allocation5 + $0x4c] ss:$16 sps:$4 sm:$0xff]  }
  0x7e   :  { %v380_v2 = vsel %vm375_vm0, %v372_v63, %v365_v62  ;;  %v2797_v62 = vld [vmem:[#allocation5 + $0xc] ss:$16 sps:$4 sm:$0xff]   ;;  %v2795_v63 = vld [vmem:[#allocation5 + $0x8] ss:$16 sps:$4 sm:$0xff]  }
  0x7f   :  { %1056 = vmatpush2.bf16.msra.mxu0 %v2681_v13  ;;  %1113 = vmatmul.mubr.bf16.vlgmr.msra.gmra.mxu1 %v389_v34  ;;  %v387_v3 = vpack.c.b16 %v380_v2, %v380_v2  ;;  %v2774_v13 = vld [vmem:[#allocation5 + $0x60] ss:$16 sps:$4 sm:$0xff]   ;;  %v2801_v2 = vld [vmem:[#allocation5 + $0x1e8] ss:$16 sps:$4 sm:$0xff]  }
  0x80   :  { %1057 = vmatprep.subr.bf16.mxu0 %v2689_v16  ;;  %1319 = vmatpush1.bf16.msra.mxu1 %v2726_v25  ;;  %v2788_v16 = vld [vmem:[#allocation5 + $0x24] ss:$16 sps:$4 sm:$0xff]   ;;  %v2810_v25 = vld [vmem:[#allocation5 + $0x1a0] ss:$16 sps:$4 sm:$0xff]  }
  0x81   :  { %1342 = vmatprep.mubr.bf16.mxu1 %v2950_v0  ;;  %1320 = vmatprep.subr.bf16.mxu1 %v2731_v29  ;;  %v2824_v29 = vld [vmem:[#allocation5 + $0x164] ss:$16 sps:$4 sm:$0xff]  }
  0x83   :  { %1058 = vmatpush2.bf16.msra.mxu0 %v2687_v26  ;;  %v2818_v26 = vld [vmem:[#allocation5 + $0x184] ss:$16 sps:$4 sm:$0xff]  }
  0x84   :  { %1059 = vmatprep.subr.bf16.mxu0 %v2695_v30  ;;  %1321 = vmatpush1.bf16.msra.mxu1 %v2729_v36  ;;  %v2358_v30 = vld [vmem:[%s3258_s4] ss:$0 sm:$0xff]  ;;  %v2738_v36 = vld [vmem:[%s3260_s6 + $0x68] ss:$16 sps:$4 sm:$0xff]  }
  0x85   :  { %1322 = vmatprep.subr.bf16.mxu1 %v2734_v39  ;;  %v2828_v39 = vld [vmem:[#allocation5 + $0x140] ss:$16 sps:$4 sm:$0xff]  }
  0x87   :  { %1060 = vmatpush2.bf16.msra.mxu0 %v2693_v37 }
  0x88   :  { %1061 = vmatprep.subr.bf16.mxu0 %v2701_v40  ;;  %1323 = vmatpush1.bf16.msra.mxu1 %v2732_v44  ;;  %v2741_v40 = vld [vmem:[%s3260_s6 + $0x48] ss:$16 sps:$4 sm:$0xff]   ;;  %v2836_v44 = vld [vmem:[#allocation5 + $0x124] ss:$16 sps:$4 sm:$0xff]  }
  0x89   :  { %1324 = vmatprep.subr.bf16.mxu1 %v2737_v46  ;;  %v2755_v46 = vld [vmem:[#allocation5 + $0xec] ss:$16 sps:$4 sm:$0xff]  }
  0x8b   :  { %1062 = vmatpush2.bf16.msra.mxu0 %v2699_v45  ;;  %v2834_v45 = vld [vmem:[#allocation5 + $0x120] ss:$16 sps:$4 sm:$0xff]  }
  0x8c   :  { %1063 = vmatprep.subr.bf16.mxu0 %v2707_v47  ;;  %1325 = vmatpush1.bf16.msra.mxu1 %v2735_v50  ;;  %v2842_v47 = vld [vmem:[#allocation5 + $0x104] ss:$16 sps:$4 sm:$0xff]   ;;  %v2761_v50 = vld [vmem:[#allocation5 + $0xcc] ss:$16 sps:$4 sm:$0xff]  }
  0x8d   :  { %1359 = vmatprep.subr.bf16.mxu1 %v2740_v52  ;;  %v2767_v52 = vld [vmem:[#allocation5 + $0xac] ss:$16 sps:$4 sm:$0xff]  }
  0x8f   :  { %1064 = vmatpush2.bf16.msra.mxu0 %v2705_v51  ;;  %v2759_v51 = vld [vmem:[#allocation5 + $0xc8] ss:$16 sps:$4 sm:$0xff]  }
  0x90   :  { %1065 = vmatprep.subr.bf16.mxu0 %v2713_v53  ;;  %v2765_v53 = vld [vmem:[#allocation5 + $0xa8] ss:$16 sps:$4 sm:$0xff]  }
  0x93   :  { %1066 = vmatpush2.bf16.msra.mxu0 %v2711_v56  ;;  %v2779_v56 = vld [vmem:[#allocation5 + $0x6c] ss:$16 sps:$4 sm:$0xff]  }
  0x94   :  { %1067 = vmatprep.subr.bf16.mxu0 %v2719_v57  ;;  %v2777_v57 = vld [vmem:[#allocation5 + $0x68] ss:$16 sps:$4 sm:$0xff]  }
  0x97   :  { %1068 = vmatpush2.bf16.msra.mxu0 %v2717_v60  ;;  %v2791_v60 = vld [vmem:[#allocation5 + $0x2c] ss:$16 sps:$4 sm:$0xff]  }
  0x98   :  { %1069 = vmatprep.subr.bf16.mxu0 %v2725_v61  ;;  %v2789_v61 = vld [vmem:[#allocation5 + $0x28] ss:$16 sps:$4 sm:$0xff]  }
  0x9b   :  { %1070 = vmatpush2.bf16.msra.mxu0 %v2723_v1  ;;  %v2803_v1 = vld [vmem:[#allocation5 + $0x1ec] ss:$16 sps:$4 sm:$0xff]  }
  0x9c   :  { %1712 = vmatprep.subr.bf16.mxu0 %v2752_v5  ;;  %v2815_v5 = vld [vmem:[#allocation5 + $0x1ac] ss:$16 sps:$4 sm:$0xff]  }
  0x9e   :  { %1072 = vmatmul.mubr.bf16.vlgmr.msra.gmra.mxu0 %v387_v3  ;;  %v2809_v3 = vld [vmem:[#allocation5 + $0x1cc] ss:$16 sps:$4 sm:$0xff]  }
  0x9f   :  { %1713 = vmatpush1.bf16.msra.mxu0 %v2750_v4  ;;  %v2807_v4 = vld [vmem:[#allocation5 + $0x1c8] ss:$16 sps:$4 sm:$0xff]  }
  0xa0   :  { %1714 = vmatprep.subr.bf16.mxu0 %v2758_v6  ;;  %v2813_v6 = vld [vmem:[#allocation5 + $0x1a8] ss:$16 sps:$4 sm:$0xff]  }
  0xa3   :  { %1715 = vmatpush1.bf16.msra.mxu0 %v2756_v7  ;;  %v2821_v7 = vld [vmem:[#allocation5 + $0x18c] ss:$16 sps:$4 sm:$0xff]  }
  0xa4   :  { %1716 = vmatprep.subr.bf16.mxu0 %v2764_v8  ;;  %v2819_v8 = vld [vmem:[#allocation5 + $0x188] ss:$16 sps:$4 sm:$0xff]  }
  0xa7   :  { %1717 = vmatpush1.bf16.msra.mxu0 %v2762_v9  ;;  %v2827_v9 = vld [vmem:[#allocation5 + $0x16c] ss:$16 sps:$4 sm:$0xff]  }
  0xa8   :  { %1718 = vmatprep.subr.bf16.mxu0 %v2770_v10  ;;  %v2825_v10 = vld [vmem:[#allocation5 + $0x168] ss:$16 sps:$4 sm:$0xff]  }
  0xab   :  { %1719 = vmatpush1.bf16.msra.mxu0 %v2768_v11  ;;  %v2833_v11 = vld [vmem:[#allocation5 + $0x14c] ss:$16 sps:$4 sm:$0xff]  }
  0xac   :  { %1720 = vmatprep.subr.bf16.mxu0 %v2776_v12  ;;  %v2831_v12 = vld [vmem:[#allocation5 + $0x148] ss:$16 sps:$4 sm:$0xff]  }
  0xaf   :  { %1721 = vmatpush1.bf16.msra.mxu0 %v2774_v13  ;;  %v2839_v13 = vld [vmem:[#allocation5 + $0x12c] ss:$16 sps:$4 sm:$0xff]  }
  0xb0   :  { %1722 = vmatprep.subr.bf16.mxu0 %v2782_v14  ;;  %v2837_v14 = vld [vmem:[#allocation5 + $0x128] ss:$16 sps:$4 sm:$0xff]  }
  0xb3   :  { %1723 = vmatpush1.bf16.msra.mxu0 %v2780_v15 }
  0xb4   :  { %1724 = vmatprep.subr.bf16.mxu0 %v2788_v16  ;;  %v2845_v16 = vld [vmem:[#allocation5 + $0x10c] ss:$16 sps:$4 sm:$0xff]  }
  0xb7   :  { %1725 = vmatpush1.bf16.msra.mxu0 %v2786_v17 }
  0xb8   :  { %1726 = vmatprep.subr.bf16.mxu0 %v2794_v18 }
  0xbb   :  { %1727 = vmatpush1.bf16.msra.mxu0 %v2792_v19  ;;  %v2843_v19 = vld [vmem:[#allocation5 + $0x108] ss:$16 sps:$4 sm:$0xff]  }
  0xbc   :  { %1728 = vmatprep.subr.bf16.mxu0 %v2800_v20  ;;  %v1126_v31 = vpop.permute.xlu0 %1125 }
  0xbd   :  { %v1134_v32 = vmul.f32 %v2357_v27, %v1126_v31 }
  0xbf   :  { %1729 = vmatpush2.bf16.msra.mxu0 %v2798_v21  ;;  %v1142_v34 = vadd.f32 %v2358_v30, %v1134_v32 }
  0xc0   :  { %1730 = vmatprep.subr.bf16.mxu0 %v2806_v22 }
  0xc1   :  { %v1209_v37 = vpack.c.bf16 %v1142_v34, %v1142_v34 }
  0xc3   :  { %1731 = vmatpush2.bf16.msra.mxu0 %v2804_v23  ;;  %2375 = vmatmul.mubr.msk.bf16.vlgmr.msra.gmra.mxu1 %vm1306_vm1, %v1209_v37 }
  0xc4   :  { %1732 = vmatprep.subr.bf16.mxu0 %v2812_v24  ;;  %1360 = vmatpush1.bf16.msra.mxu1 %v2738_v36 }
  0xc5   :  { %1383 = vmatprep.mubr.bf16.mxu1 %v2950_v0  ;;  %1361 = vmatprep.subr.bf16.mxu1 %v2743_v38  ;;  %v2747_v0 = vld [vmem:[%s3260_s6 + $0x8] ss:$16 sps:$4 sm:$0xff]   ;;  %s2235_s6 = sshll.u32 %s2953_s20, 4  ;;  %s2236_s6 = int_to_ptr.vmem [resolvable:$true] %s2235_s6 }
  0xc6   :  { %s2918_s21 = scalar_lea.vmem %s2236_s6, 32  ;;  %p2923_p11 = scmp.lt.s32.totalorder %s2236_s6, %s2236_s6 }
  0xc7   :  { %1733 = vmatpush2.bf16.msra.mxu0 %v2810_v25  ;;  %v2846_v25 = vld [vmem:[%s3261_s7 + $0x78] sm:$0xff]   ;;  %p2919_p10 = scmp.ne.s32.totalorder %s2236_s6, %s2918_s21  ;;  %p2924_p12 = scmp.lt.s32.totalorder %s2918_s21, %s2918_s21 }
  0xc8   :  { %1734 = vmatprep.subr.bf16.mxu0 %v2818_v26  ;;  %1362 = vmatpush1.bf16.msra.mxu1 %v2741_v40  ;;  %v2847_v26 = vld [vmem:[%s3261_s7 + $0xf8] sm:$0xff]  }
  0xc9   :  { %1363 = vmatprep.subr.bf16.mxu1 %v2746_v41  ;;  %p2925_p13 = por %p2924_p12, %p2923_p11 }
  0xcb   :  { %1735 = vmatpush2.bf16.msra.mxu0 %v2816_v28  ;;  %p2926_p0 = pnand %p2925_p13, %p2919_p10 }
  0xcc   :  { %1736 = vmatprep.subr.bf16.mxu0 %v2824_v29  ;;  %1364 = vmatpush1.bf16.msra.mxu1 %v2744_v42  ;;  %v2848_v42 = vld [vmem:[%s3261_s7 + $0x38] sm:$0xff]  }
  0xcd   :  { %1365 = vmatprep.subr.bf16.mxu1 %v2749_v43  ;;  %v2849_v43 = vld [vmem:[%s3261_s7 + $0xb8] sm:$0xff]  }
  0xcf   :  { %1737 = vmatpush2.bf16.msra.mxu0 %v2822_v33 }
  0xd0   :  { %1738 = vmatprep.subr.bf16.mxu0 %v2830_v35  ;;  %1366 = vmatpush1.bf16.msra.mxu1 %v2747_v0  ;;  %v2850_v0 = vld [vmem:[%s3261_s7 + $0x70] sm:$0xff]  }
  0xd1   :  { %1753 = vmatprep.subr.bf16.mxu1 %v2755_v46  ;;  %v2852_v46 = vld [vmem:[%s3261_s7 + $0x30] sm:$0xff]  }
  0xd3   :  { %1739 = vmatpush2.bf16.msra.mxu0 %v2828_v39  ;;  %2376 = vmatmul.mubr.msk.bf16.vlgmr.msra.gmra.mxu1 %vm1306_vm1, %v1209_v37 }
  0xd4   :  { %1740 = vmatprep.subr.bf16.mxu0 %v2836_v44  ;;  %1754 = vmatpush1.bf16.msra.mxu1 %v2753_v48  ;;  %v2854_v48 = vld [vmem:[%s3261_s7 + $0x68] sm:$0xff]  }
  0xd5   :  { %1755 = vmatprep.subr.bf16.mxu1 %v2761_v50  ;;  %v2856_v50 = vld [vmem:[%s3261_s7 + $0x28] sm:$0xff]  }
  0xd7   :  { %1741 = vmatpush2.bf16.msra.mxu0 %v2834_v45  ;;  %v2851_v45 = vld [vmem:[%s3261_s7 + $0xf0] sm:$0xff]  }
  0xd8   :  { %1742 = vmatprep.subr.bf16.mxu0 %v2842_v47  ;;  %1756 = vmatpush1.bf16.msra.mxu1 %v2759_v51  ;;  %v2853_v47 = vld [vmem:[%s3261_s7 + $0xb0] sm:$0xff]   ;;  %v2857_v51 = vld [vmem:[%s3261_s7 + $0xa8] sm:$0xff]  }
  0xd9   :  { %1757 = vmatprep.subr.bf16.mxu1 %v2767_v52  ;;  %v2858_v52 = vld [vmem:[%s3261_s7 + $0x60] sm:$0xff]  }
  0xdb   :  { %1743 = vmatpush2.bf16.msra.mxu0 %v2840_v49  ;;  %v2855_v49 = vld [vmem:[%s3261_s7 + $0xe8] sm:$0xff]  }
  0xdc   :  { %1758 = vmatpush1.bf16.msra.mxu1 %v2765_v53  ;;  %2475 = vmatprep.subr.bf16.mxu0 %v2846_v25  ;;  %v2859_v53 = vld [vmem:[%s3261_s7 + $0xe0] sm:$0xff]  }
  0xdd   :  { %1759 = vmatprep.subr.bf16.mxu1 %v2773_v54  ;;  %v2860_v54 = vld [vmem:[%s3261_s7 + $0x20] sm:$0xff]  }
  0xe0   :  { %1760 = vmatpush1.bf16.msra.mxu1 %v2771_v55  ;;  %v2861_v55 = vld [vmem:[%s3261_s7 + $0xa0] sm:$0xff]  }
  0xe1   :  { %1761 = vmatprep.subr.bf16.mxu1 %v2779_v56  ;;  %v2862_v56 = vld [vmem:[%s3261_s7 + $0x58] sm:$0xff]  }
  0xe4   :  { %1762 = vmatpush1.bf16.msra.mxu1 %v2777_v57  ;;  %v2863_v57 = vld [vmem:[%s3261_s7 + $0xd8] sm:$0xff]  }
  0xe5   :  { %1763 = vmatprep.subr.bf16.mxu1 %v2785_v58  ;;  %v2864_v58 = vld [vmem:[%s3261_s7 + $0x18] sm:$0xff]  }
  0xe8   :  { %1764 = vmatpush1.bf16.msra.mxu1 %v2783_v59  ;;  %v2865_v59 = vld [vmem:[%s3261_s7 + $0x98] sm:$0xff]  }
  0xe9   :  { %1765 = vmatprep.subr.bf16.mxu1 %v2791_v60  ;;  %v2866_v60 = vld [vmem:[%s3261_s7 + $0x50] sm:$0xff]  }
  0xec   :  { %1766 = vmatpush1.bf16.msra.mxu1 %v2789_v61  ;;  %v2867_v61 = vld [vmem:[%s3261_s7 + $0xd0] sm:$0xff]  }
  0xed   :  { %1767 = vmatprep.subr.bf16.mxu1 %v2797_v62  ;;  %v2868_v62 = vld [vmem:[%s3261_s7 + $0x10] sm:$0xff]  }
  0xf0   :  { %1768 = vmatpush1.bf16.msra.mxu1 %v2795_v63  ;;  %v2869_v63 = vld [vmem:[%s3261_s7 + $0x90] sm:$0xff]  }
  0xf1   :  { %1769 = vmatprep.subr.bf16.mxu1 %v2803_v1 }
  0xf4   :  { %1770 = vmatpush2.bf16.msra.mxu1 %v2801_v2 }
  0xf5   :  { %1771 = vmatprep.subr.bf16.mxu1 %v2809_v3 }
  0xf8   :  { %1772 = vmatpush2.bf16.msra.mxu1 %v2807_v4 }
  0xf9   :  { %1773 = vmatprep.subr.bf16.mxu1 %v2815_v5 }
  0xfc   :  { %1774 = vmatpush2.bf16.msra.mxu1 %v2813_v6 }
  0xfd   :  { %1775 = vmatprep.subr.bf16.mxu1 %v2821_v7  ;;  %v2870_v7 = vld [vmem:[%s3261_s7 + $0x48] sm:$0xff]  }
 0x100   :  { %1776 = vmatpush2.bf16.msra.mxu1 %v2819_v8  ;;  %v2871_v8 = vld [vmem:[%s3261_s7 + $0xc8] sm:$0xff]  }
 0x101   :  { %1777 = vmatprep.subr.bf16.mxu1 %v2827_v9  ;;  %v2872_v9 = vld [vmem:[%s3261_s7 + $0x8] sm:$0xff]  }
 0x104   :  { %1778 = vmatpush2.bf16.msra.mxu1 %v2825_v10  ;;  %v2873_v10 = vld [vmem:[%s3261_s7 + $0x88] sm:$0xff]  }
 0x105   :  { %1779 = vmatprep.subr.bf16.mxu1 %v2833_v11 }
 0x108   :  { %1780 = vmatpush2.bf16.msra.mxu1 %v2831_v12 }
 0x109   :  { %1781 = vmatprep.subr.bf16.mxu1 %v2839_v13  ;;  %v2874_v13 = vld [vmem:[%s3261_s7 + $0x40] sm:$0xff]  }
 0x10c   :  { %1782 = vmatpush2.bf16.msra.mxu1 %v2837_v14  ;;  %v2875_v14 = vld [vmem:[%s3261_s7 + $0xc0] sm:$0xff]  }
 0x10d   :  { %1783 = vmatprep.subr.bf16.mxu1 %v2845_v16  ;;  %v2877_v16 = vld [vmem:[%s3261_s7 + $0x80] sm:$0xff]  }
 0x110   :  { %1784 = vmatpush2.bf16.msra.mxu1 %v2843_v19 }
 0x111   :  { %2497 = vmatprep.subr.bf16.mxu1 %v2847_v26 }
 0x11e   :  { %v991_v15 = vpop.f32.mrf.mxu0 }
 0x11f   :  { %v1032_v17 = vpop.f32.mrf.mxu1 }
 0x120   :  { %v993_v18 = vpop.f32.mrf.mxu0  ;;  %v1033_v31 = vadd.f32 %v1032_v17, %v991_v15  ;;  %v2876_v15 = vld [vmem:[%s3261_s7] sm:$0xff]   ;;  %v2951_v17 = vmov 0.0  }
 0x121   :  { %v1034_v20 = vpop.f32.mrf.mxu1 }
 0x122   :  { %v995_v21 = vpop.f32.mrf.mxu0  ;;  %v1035_v33 = vadd.f32 %v1034_v20, %v993_v18 }
 0x123   :  { %v1036_v23 = vpop.f32.mrf.mxu1 }
 0x124   :  { %v996_v22 = vpop.f32.mrf.mxu0 }
 0x125   :  { %v1037_v24 = vpop.f32.mrf.mxu1 }
 0x13f   :  { %v1114_v27 = vpop.f32.mrf.mxu1 }
 0x141   :  { %v1116_v28 = vpop.f32.mrf.mxu1 }
 0x143   :  { %v1118_v29 = vpop.f32.mrf.mxu1 }
 0x145   :  { %v1119_v30 = vpop.f32.mrf.mxu1 }
 0x15e   :  { %v1073_v32 = vpop.f32.mrf.mxu0 }
 0x15f   :  { %v1074_v34 = vadd.f32 %v1073_v32, %v1033_v31 }
 0x160   :  { %v1075_v35 = vpop.f32.mrf.mxu0 }
 0x161   :  { %v1076_v36 = vadd.f32 %v1075_v35, %v1035_v33  ;;  %v1115_v37 = vadd.f32 %v1114_v27, %v1074_v34 }
 0x162   :  { %v1077_v38 = vpop.f32.mrf.mxu0 }
 0x163   :  { %v1117_v39 = vadd.f32 %v1116_v28, %v1076_v36  ;;  %v1143_v44 = vpack.c.bf16 %v1115_v37, %v1115_v37  ;;  %v2146_v38 = vld [vmem:[%s3262_s8 + $0x38] sm:$0xff] }
 0x164   :  { %v1078_v40 = vpop.f32.mrf.mxu0 }
 0x165   :  { %v1144_v41 = vpack.c.bf16 %v1117_v39, %v1117_v39  ;;  %v2145_v39 = vld [vmem:[%s3262_s8 + $0x30] sm:$0xff]  ;;  %v2144_v40 = vld [vmem:[%s3262_s8 + $0x28] sm:$0xff] }
 0x167   :  { %1744 = vmatprep.mubr.bf16.mxu0 %v1144_v41  ;;  %1785 = vmatprep.mubr.bf16.mxu1 %v1144_v41  ;;  %v2143_v41 = vld [vmem:[%s3262_s8 + $0x20] sm:$0xff] }
 0x168   :  { %1745 = vmatmul.mubr.bf16.vlgmr.msra.gmra.mxu0 %v1143_v44  ;;  %1786 = vmatmul.mubr.bf16.vlgmr.msra.gmra.mxu1 %v1143_v44  ;;  %v2140_v44 = vld [vmem:[%s3262_s8 + $0x8] sm:$0xff] }
 0x169   :  { %2476 = vmatpush3.bf16.msra.mxu0 %v2848_v42  ;;  %2498 = vmatpush3.bf16.msra.mxu1 %v2849_v43  ;;  %v2142_v42 = vld [vmem:[%s3262_s8 + $0x18] sm:$0xff]  ;;  %v2141_v43 = vld [vmem:[%s3262_s8 + $0x10] sm:$0xff] }
 0x16a   :  { %2477 = vmatprep.subr.bf16.mxu0 %v2850_v0  ;;  %2499 = vmatprep.subr.bf16.mxu1 %v2851_v45  ;;  %v2139_v0 = vld [vmem:[%s3262_s8] sm:$0xff] }
 0x16d   :  { %2478 = vmatpush3.bf16.msra.mxu0 %v2852_v46  ;;  %2500 = vmatpush3.bf16.msra.mxu1 %v2853_v47 }
 0x16e   :  { %2479 = vmatprep.subr.bf16.mxu0 %v2854_v48  ;;  %2501 = vmatprep.subr.bf16.mxu1 %v2855_v49 }
 0x171   :  { %2480 = vmatpush3.bf16.msra.mxu0 %v2856_v50  ;;  %2502 = vmatpush3.bf16.msra.mxu1 %v2857_v51 }
 0x172   :  { %2481 = vmatprep.subr.bf16.mxu0 %v2858_v52  ;;  %2503 = vmatprep.subr.bf16.mxu1 %v2859_v53 }
 0x175   :  { %2482 = vmatpush3.bf16.msra.mxu0 %v2860_v54  ;;  %2504 = vmatpush3.bf16.msra.mxu1 %v2861_v55 }
 0x176   :  { %2483 = vmatprep.subr.bf16.mxu0 %v2862_v56  ;;  %2505 = vmatprep.subr.bf16.mxu1 %v2863_v57  ;;  %v2473_v57 = vld [vmem:[%s3263_s9] ss:$0 sm:$0xff] }
 0x179   :  { %2484 = vmatpush3.bf16.msra.mxu0 %v2864_v58  ;;  %2506 = vmatpush3.bf16.msra.mxu1 %v2865_v59 }
 0x17a   :  { %2485 = vmatprep.subr.bf16.mxu0 %v2866_v60  ;;  %2507 = vmatprep.subr.bf16.mxu1 %v2867_v61 }
 0x17d   :  { %2486 = vmatpush3.bf16.msra.mxu0 %v2868_v62  ;;  %2508 = vmatpush3.bf16.msra.mxu1 %v2869_v63 }
 0x17e   :  { %2487 = vmatprep.subr.bf16.mxu0 %v2870_v7  ;;  %2509 = vmatprep.subr.bf16.mxu1 %v2871_v8 }
 0x181   :  { %2488 = vmatpush3.bf16.msra.mxu0 %v2872_v9  ;;  %2510 = vmatpush3.bf16.msra.mxu1 %v2873_v10 }
 0x182   :  { %2489 = vmatprep.subr.bf16.mxu0 %v2874_v13  ;;  %2511 = vmatprep.subr.bf16.mxu1 %v2875_v14 }
 0x183   :  { %v1344_v1 = vpop.f32.mrf.mxu1 }
 0x185   :  { %v1346_v2 = vpop.f32.mrf.mxu1  ;;  %2490 = vmatpush3.bf16.msra.mxu0 %v2876_v15  ;;  %2512 = vmatpush3.bf16.msra.mxu1 %v2877_v16 }
 0x186   :  { %2528 = vmatprep.subr.mxu0 %v2951_v17 }
 0x187   :  { %v1348_v3 = vpop.f32.mrf.mxu1 }
 0x189   :  { %v1349_v4 = vpop.f32.mrf.mxu1 }
 0x193   :  { %v1385_v5 = vpop.f32.mrf.mxu1 }
 0x195   :  { %v1387_v6 = vpop.f32.mrf.mxu1 }
 0x197   :  { %v1389_v11 = vpop.f32.mrf.mxu1 }
 0x199   :  { %v1390_v12 = vpop.f32.mrf.mxu1 }
 0x228   :  { %v1746_v18 = vpop.f32.mrf.mxu0  ;;  %v1787_v19 = vpop.f32.mrf.mxu1 }
 0x229   :  { %v1747_v20 = vadd.f32 %v1746_v18, %v1344_v1  ;;  %v1788_v21 = vadd.f32 %v1787_v19, %v1385_v5 }
 0x22a   :  { %v1748_v22 = vpop.f32.mrf.mxu0  ;;  %v1789_v23 = vpop.f32.mrf.mxu1 }
 0x22b   :  { %v1749_v24 = vadd.f32 %v1748_v22, %v1346_v2  ;;  %v1790_v25 = vadd.f32 %v1789_v23, %v1387_v6  ;;  %v1794_v26 = vmax.f32 %v1747_v20, 0.0  ;;  %v1796_v27 = vmax.f32 %v1788_v21, 0.0 }
 0x22c   :  { %v1750_v28 = vpop.f32.mrf.mxu0  ;;  %v1791_v29 = vpop.f32.mrf.mxu1 }
 0x22d   :  { %v1795_v30 = vmax.f32 %v1749_v24, 0.0  ;;  %v1797_v31 = vmax.f32 %v1790_v25, 0.0  ;;  %v1798_v36 = vpack.c.bf16 %v1794_v26, %v1794_v26  ;;  %v1800_v37 = vpack.c.bf16 %v1796_v27, %v1796_v27 }
 0x22e   :  { %v1751_v32 = vpop.f32.mrf.mxu0  ;;  %v1792_v33 = vpop.f32.mrf.mxu1 }
 0x22f   :  { %v1799_v34 = vpack.c.bf16 %v1795_v30, %v1795_v30  ;;  %v1801_v35 = vpack.c.bf16 %v1797_v31, %v1797_v31 }
 0x231   :  { %2090 = vmatprep.mubr.bf16.mxu0 %v1799_v34  ;;  %2130 = vmatprep.mubr.bf16.mxu1 %v1801_v35 }
 0x232   :  { %2091 = vmatmul.mubr.bf16.vlgmr.msra.gmra.mxu0 %v1798_v36  ;;  %2131 = vmatmul.mubr.bf16.vlgmr.msra.gmra.mxu1 %v1800_v37 }
 0x233   :  { %2529 = vmatpush3.msra.mxu0 %v2146_v38  ;;  %2544 = vmatprep.mubr.msk.f32.mxu0 %vm2952_vm2, %v2951_v17 }
 0x234   :  { %2530 = vmatprep.subr.mxu0 %v2951_v17 }
 0x235   :  { %2531 = vmatpush3.msra.mxu0 %v2145_v39 }
 0x236   :  { %2532 = vmatprep.subr.mxu0 %v2951_v17 }
 0x237   :  { %2533 = vmatpush3.msra.mxu0 %v2144_v40 }
 0x238   :  { %2534 = vmatprep.subr.mxu0 %v2951_v17 }
 0x239   :  { %2535 = vmatpush3.msra.mxu0 %v2143_v41 }
 0x23a   :  { %2536 = vmatprep.subr.mxu0 %v2951_v17 }
 0x23b   :  { %2537 = vmatpush3.msra.mxu0 %v2142_v42 }
 0x23c   :  { %2538 = vmatprep.subr.mxu0 %v2951_v17 }
 0x23d   :  { %2539 = vmatpush3.msra.mxu0 %v2141_v43 }
 0x23e   :  { %2540 = vmatprep.subr.mxu0 %v2951_v17 }
 0x23f   :  { %2541 = vmatpush3.msra.mxu0 %v2140_v44 }
 0x240   :  { %2542 = vmatprep.subr.mxu0 %v2951_v17 }
 0x241   :  { %2543 = vmatpush3.msra.mxu0 %v2139_v0 }
 0x2f2   :  { %v2491_v45 = vpop.f32.mrf.mxu0  ;;  %v2513_v46 = vpop.f32.mrf.mxu1 }
 0x2f4   :  { %v2492_v47 = vpop.f32.mrf.mxu0  ;;  %v2514_v48 = vpop.f32.mrf.mxu1 }
 0x2f5   :  { %v2493_v49 = vadd.f32 %v2492_v47, %v2491_v45  ;;  %v2515_v50 = vadd.f32 %v2514_v48, %v2513_v46 }
 0x2f6   :  { %v2494_v51 = vpop.f32.mrf.mxu0  ;;  %v2516_v52 = vpop.f32.mrf.mxu1 }
 0x2f7   :  { %v2133_v53 = vadd.f32 %v2515_v50, %v2493_v49 }
 0x2f8   :  { %v2495_v54 = vpop.f32.mrf.mxu0  ;;  %v2517_v55 = vpop.f32.mrf.mxu1 }
 0x2f9   :  { %v2138_v56 = vmax.f32 %v2133_v53, 0.0 }
 0x2fb   :  { %2545 = vmatmul.mubr.msk.f32.vlgmr.msra.gmra.mxu0 %vm1306_vm1, %v2138_v56 }
 0x3bb   :  { %v2223_v58 = vpop.f32.mrf.mxu0 }
 0x3bc   :  { %v2224_v59 = vadd.f32 %v2473_v57, %v2223_v58 }
 0x3bd   :  { %v2546_v60 = vpop.f32.mrf.mxu0 }
 0x3be   :  { %2228 = vst.msk [vmem:[#allocation7] sm:$0x3] %vm2227_vm3, %v2224_v59 }
 0x3bf   :  { %2929 = shalt.err (!%p2926_p0)
}
 0x3c0   :  { %2238 = dma.vmem_to_hbm [thread:$0]  %s2236_s6, 32, %s3264_s10, [#allocation4]  }
 0x3c1   :  { %2942 = dma.done.wait [#allocation4], 32  }
 0x3c2   :  { %2943 = vsyncadd [#allocation4], 4294967264 }
 0x3c3   :  { %2242 = vsyncpa [#allocation3], 1 }
 0x3c4   :  { %2243 = vsyncpa [#allocation6], 1 }
 0x3c5   :  { %2244 = vsyncpa [#allocation4], 1 }

</bundles_post_ra>
